<compile_context>
chip_gen: v7x
topology: tpu7x:2x2x1
jax: 0.10.0
libtpu: 0.0.40
codegen_flags: <defaults>
</compile_context>

<pallas_src>
import functools

import jax
import jax.numpy as jnp
from jax.experimental import pallas as pl
from jax.experimental.pallas import tpu as pltpu


_LANES = 128                    # lane width of a vreg (last dim of the slab)
_TARGET_BLOCK_BYTES = 4 << 20   # 4 MiB blocks; 4x double-buffered = 16 MiB VMEM
_SMALL_INPUT_BYTES = 512 << 10  # below this, plain XLA elementwise is faster
_MIN_GRID_STEPS = 8             # >= 4 steps per TC after v7x "parallel" split


def _round_up(x: int, m: int) -> int:
    return ((x + m - 1) // m) * m


def _sublane(dtype) -> int:
    # Packed-dtype minimum for the second-to-last block dim:
    # f32 -> 8, bf16/f16 -> 16, int8/fp8 -> 32.
    return max(8, 32 // jnp.dtype(dtype).itemsize)


def _relu_kernel(x_ref, o_ref):
    # 1 vld + 1 vmax + 1 vst per vreg — strictly HBM-bound; nothing else needed.
    o_ref[...] = jnp.maximum(x_ref[...], 0)


@functools.partial(jax.jit, donate_argnums=(0,))
def cnn_forward(x):
    """Forward pass of CNN (pure ReLU).

    Args:
      x: array of shape (N, 1, 2, 2) — NCHW, as produced by
         torch.reshape(input, (-1, 1, 2, 2)).  Any shape/dtype works; the
         wrapper flattens to a lane-dense 2D slab internally.
    Returns:
      ReLU(x), same shape and dtype.
    """
    orig_shape = x.shape
    total = x.size
    itemsize = jnp.dtype(x.dtype).itemsize

    # ---- Small-input fast path --------------------------------------------
    # pallas_call dispatch + grid fixed cost dominates below a few hundred KiB.
    if total * itemsize < _SMALL_INPUT_BYTES:
        return jnp.maximum(x, 0)

    sublane = _sublane(x.dtype)

    # ---- Flatten to a lane-dense (rows, 128) slab --------------------------
    rows = pl.cdiv(total, _LANES)
    padded_rows = _round_up(rows, sublane)        # minimal (sublane, 128) granule
    padded_total = padded_rows * _LANES

    x_flat = jnp.ravel(x)
    if padded_total != total:
        # Zero padding is ReLU-safe and is sliced off below.
        x_flat = jnp.pad(x_flat, (0, padded_total - total))
    x2d = jnp.reshape(x_flat, (padded_rows, _LANES))

    # ---- Row tiling ---------------------------------------------------------
    # Biggest block up to 4 MiB, but keep >= _MIN_GRID_STEPS grid steps so the
    # pipeline (and the dual-TC split on v7x) actually overlaps DMA and compute.
    cap = max(sublane,
              (_TARGET_BLOCK_BYTES // (itemsize * _LANES)) // sublane * sublane)
    tile_r = min(cap, _round_up(pl.cdiv(padded_rows, _MIN_GRID_STEPS), sublane))
    grid = (pl.cdiv(padded_rows, tile_r),)        # last block may be partial

    block_bytes = tile_r * _LANES * itemsize
    # Only input + output double-buffering needs to fit; add headroom.
    vmem_limit = max(16 << 20, 4 * block_bytes + (2 << 20))

    out2d = pl.pallas_call(
        _relu_kernel,
        out_shape=jax.ShapeDtypeStruct((padded_rows, _LANES), x.dtype),
        grid=grid,
        in_specs=[pl.BlockSpec((tile_r, _LANES), lambda i: (i, 0))],
        out_specs=pl.BlockSpec((tile_r, _LANES), lambda i: (i, 0)),
        input_output_aliases={0: 0},              # ReLU is in-place safe
        compiler_params=pltpu.CompilerParams(
            dimension_semantics=("parallel",),
            vmem_limit_bytes=int(vmem_limit),
        ),
    )(x2d)

    out_flat = jnp.reshape(out2d, (padded_total,))
    if padded_total != total:
        out_flat = out_flat[:total]
    return jnp.reshape(out_flat, orig_shape)


if __name__ == "__main__":
    # Case 1: large, lane-aligned input.  (4096, 128) f32 = 2 MiB raw data
    # reshaped to NCHW (-1, 1, 2, 2) exactly as the PyTorch driver does
    # (131072 images of (1, 2, 2)).  Exercises the pipelined Pallas path.
    raw = jax.random.normal(jax.random.PRNGKey(0), (4096, 128), dtype=jnp.float32)
    x = jnp.reshape(raw, (-1, 1, 2, 2))
    ref = jnp.maximum(x, 0.0)
    shp, dt = x.shape, x.dtype
    out = jax.block_until_ready(cnn_forward(x))   # x is donated
    assert out.shape == shp and out.dtype == dt
    assert bool(jnp.allclose(out, ref)), "mismatch vs reference ReLU (aligned case)"

    # Case 2: unaligned element count (131075 images) — exercises the minimal
    # (8, 128)-granule padding and the partial last grid block.
    raw2 = jax.random.normal(jax.random.PRNGKey(1), (131075, 4), dtype=jnp.float32)
    x2 = jnp.reshape(raw2, (-1, 1, 2, 2))
    ref2 = jnp.maximum(x2, 0.0)
    shp2, dt2 = x2.shape, x2.dtype
    out2 = jax.block_until_ready(cnn_forward(x2))
    assert out2.shape == shp2 and out2.dtype == dt2
    assert bool(jnp.allclose(out2, ref2)), "mismatch vs reference ReLU (unaligned case)"

    # Case 3: the literal tiny 8-element case from the PyTorch snippet —
    # takes the small-input fast path (plain jnp.maximum).
    raw3 = jax.random.normal(jax.random.PRNGKey(2), (2, 4), dtype=jnp.float32)
    x3 = jnp.reshape(raw3, (-1, 1, 2, 2))
    ref3 = jnp.maximum(x3, 0.0)
    shp3, dt3 = x3.shape, x3.dtype
    out3 = jax.block_until_ready(cnn_forward(x3))
    assert out3.shape == shp3 and out3.dtype == dt3
    assert bool(jnp.allclose(out3, ref3)), "mismatch vs reference ReLU (tiny case)"

    print("KERNEL_OK")
</pallas_src>

<mosaic_0001>
module attributes {stable_mosaic.version = 11 : i64} {
  func.func @_relu_kernel(%arg0: i32, %arg1: memref<512x128xf32, #tpu.memory_space<vmem>>, %arg2: memref<512x128xf32, #tpu.memory_space<vmem>>) attributes {dimension_semantics = [#tpu.dimension_semantics<parallel>], iteration_bounds = array<i64: 8>, scalar_prefetch = 0 : i64, scratch_operands = 0 : i64, tpu.core_type = #tpu.core_type<tc>, window_params = [{transform_indices = @transform_0, window_bounds = array<i64: 512, 128>}, {transform_indices = @transform_1, window_bounds = array<i64: 512, 128>}]} {
    %c0 = arith.constant 0 : index
    %c0_0 = arith.constant 0 : index
    %0 = vector.load %arg1[%c0, %c0_0] : memref<512x128xf32, #tpu.memory_space<vmem>>, vector<512x128xf32>
    %cst = arith.constant 0.000000e+00 : f32
    %1 = vector.broadcast %cst : f32 to vector<512x128xf32>
    %2 = arith.maximumf %0, %1 : vector<512x128xf32>
    %c0_1 = arith.constant 0 : index
    %c0_2 = arith.constant 0 : index
    %3 = vector.load %arg2[%c0_1, %c0_2] : memref<512x128xf32, #tpu.memory_space<vmem>>, vector<512x128xf32>
    tpu.vector_store %arg2[%c0_1, %c0_2], %2 {strides = array<i32>} : memref<512x128xf32, #tpu.memory_space<vmem>>, vector<512x128xf32>,
    return
  }
  func.func @transform_0(%arg0: i32) -> (i32, i32) {
    %c0_i32 = arith.constant 0 : i32
    %c0_i32_0 = arith.constant 0 : i32
    return %arg0, %c0_i32 : i32, i32
  }
  func.func @transform_1(%arg0: i32) -> (i32, i32) {
    %c0_i32 = arith.constant 0 : i32
    %c0_i32_0 = arith.constant 0 : i32
    return %arg0, %c0_i32 : i32, i32
  }
}

</mosaic_0001>

<bundles_post_ra>
// kernel: cnn_forward.1
= control target key start
LH: loop header
LB: loop body
LE: loop exit
PB: predicated region body
PF: predicated region fallthrough
CT: control target
= control target key end

     0   :  { %s405_s6 = smov 0   ;;  %s879_s0 = inlined_call_operand.vmem [shape: f32[4096,128], index: 0, kind: input, shape index: {}, may-alias: {0,1}]   ;;  %s880_s1 = inlined_call_operand.vmem [shape: f32[4096,128], index: 1, kind: output, shape index: {}, may-alias: {0,1}]  }
   0x1 LB: > { %s368_s7 = sadd.s32 4294967295, %s393_s6   ;;  %p372_p0 = scmp.ge.s32.totalorder %s393_s6, 1  ;;  %s393_s6 = sphi %s405_s6, %s11_s6  }
   0x2   : > { %p88_p1 = scmp.lt.s32.totalorder %s393_s6, 9 }
   0x4   : > { %p89_p2 = pnand %p372_p0, %p88_p1 }
   0x6   : > { %92 = sbr.rel (%p89_p2) target bundleno = 74 (0x4a), region = 24 }
   0xd   : > { %s373_s8 = sshll.u32 %s368_s7, 6 }
   0xe   : > { %p109_p3 = scmp.lt.s32.totalorder %s373_s8, 511 }
  0x10   : > { %s962_s8 = smov (!%p109_p3, %s373_s8), 511 }
  0x11   : > { %s374_s9 = sshll.u32 %s962_s8, 3 }
  0x12   : > { %s421_s12 = scalar_lea.vmem %s879_s0, %s374_s9  ;;  %s653_s15 = scalar_lea.vmem %s880_s1, %s374_s9 }
  0x13   : > { %v424_v0 = vld [vmem:[%s421_s12] sm:$0xff]  ;;  %v427_v1 = vld [vmem:[%s421_s12 + $0x8] sm:$0xff]  ;;  %v430_v2 = vld [vmem:[%s421_s12 + $0x10] sm:$0xff] }
  0x14   : > { %v433_v3 = vld [vmem:[%s421_s12 + $0x18] sm:$0xff]  ;;  %v436_v4 = vld [vmem:[%s421_s12 + $0x20] sm:$0xff]  ;;  %v439_v5 = vld [vmem:[%s421_s12 + $0x28] sm:$0xff]  ;;  %v894_v12 = vmax.f32 %v427_v1, 0.0  ;;  %v895_v18 = vmax.f32 %v430_v2, 0.0 }
  0x15   : > { %v445_v9 = vld [vmem:[%s421_s12 + $0x30] sm:$0xff]  ;;  %v448_v10 = vld [vmem:[%s421_s12 + $0x38] sm:$0xff]  ;;  %v451_v11 = vld [vmem:[%s421_s12 + $0x40] sm:$0xff] }
  0x16   : > { %v457_v15 = vld [vmem:[%s421_s12 + $0x48] sm:$0xff]  ;;  %v460_v16 = vld [vmem:[%s421_s12 + $0x50] sm:$0xff]  ;;  %v463_v17 = vld [vmem:[%s421_s12 + $0x58] sm:$0xff]  ;;  %v899_v1 = vmax.f32 %v445_v9, 0.0  ;;  %v900_v2 = vmax.f32 %v448_v10, 0.0 }
  0x17   : > { %v469_v21 = vld [vmem:[%s421_s12 + $0x60] sm:$0xff]  ;;  %v472_v22 = vld [vmem:[%s421_s12 + $0x68] sm:$0xff]  ;;  %v475_v23 = vld [vmem:[%s421_s12 + $0x70] sm:$0xff]  ;;  %v904_v9 = vmax.f32 %v463_v17, 0.0 }
  0x18   : > { %v481_v27 = vld [vmem:[%s421_s12 + $0x78] sm:$0xff]  ;;  %v484_v28 = vld [vmem:[%s421_s12 + $0x80] sm:$0xff]  ;;  %v487_v29 = vld [vmem:[%s421_s12 + $0x88] sm:$0xff]  ;;  %v905_v10 = vmax.f32 %v469_v21, 0.0 }
  0x19   : > { %v493_v33 = vld [vmem:[%s421_s12 + $0x90] sm:$0xff]  ;;  %v496_v34 = vld [vmem:[%s421_s12 + $0x98] sm:$0xff]  ;;  %v499_v35 = vld [vmem:[%s421_s12 + $0xa0] sm:$0xff] }
  0x1a   : > { %v505_v39 = vld [vmem:[%s421_s12 + $0xa8] sm:$0xff]  ;;  %v508_v40 = vld [vmem:[%s421_s12 + $0xb0] sm:$0xff]  ;;  %v511_v41 = vld [vmem:[%s421_s12 + $0xb8] sm:$0xff]  ;;  %v911_v17 = vmax.f32 %v493_v33, 0.0  ;;  %v913_v21 = vmax.f32 %v499_v35, 0.0 }
  0x1b   : > { %v517_v45 = vld [vmem:[%s421_s12 + $0xc0] sm:$0xff]  ;;  %v520_v46 = vld [vmem:[%s421_s12 + $0xc8] sm:$0xff]  ;;  %v523_v47 = vld [vmem:[%s421_s12 + $0xd0] sm:$0xff] }
  0x1c   : > { %v529_v51 = vld [vmem:[%s421_s12 + $0xd8] sm:$0xff]  ;;  %v532_v52 = vld [vmem:[%s421_s12 + $0xe0] sm:$0xff]  ;;  %v535_v53 = vld [vmem:[%s421_s12 + $0xe8] sm:$0xff] }
  0x1d   : > { %v541_v57 = vld [vmem:[%s421_s12 + $0xf0] sm:$0xff]  ;;  %v544_v58 = vld [vmem:[%s421_s12 + $0xf8] sm:$0xff]  ;;  %v547_v59 = vld [vmem:[%s421_s12 + $0x100] sm:$0xff]  ;;  %v921_v33 = vmax.f32 %v532_v52, 0.0 }
  0x1e   : > { %v553_v63 = vld [vmem:[%s421_s12 + $0x108] sm:$0xff]  ;;  %v556_v55 = vld [vmem:[%s421_s12 + $0x110] sm:$0xff]  ;;  %v559_v56 = vld [vmem:[%s421_s12 + $0x118] sm:$0xff]  ;;  %v923_v35 = vmax.f32 %v541_v57, 0.0 }
  0x1f   : > { %v565_v49 = vld [vmem:[%s421_s12 + $0x120] sm:$0xff]  ;;  %v568_v61 = vld [vmem:[%s421_s12 + $0x128] sm:$0xff]  ;;  %v571_v62 = vld [vmem:[%s421_s12 + $0x130] sm:$0xff] }
  0x20   : > { %v577_v43 = vld [vmem:[%s421_s12 + $0x138] sm:$0xff]  ;;  %v580_v50 = vld [vmem:[%s421_s12 + $0x140] sm:$0xff]  ;;  %v583_v60 = vld [vmem:[%s421_s12 + $0x148] sm:$0xff]  ;;  %v931_v52 = vmax.f32 %v571_v62, 0.0 }
  0x21   : > { %v589_v37 = vld [vmem:[%s421_s12 + $0x150] sm:$0xff]  ;;  %v592_v44 = vld [vmem:[%s421_s12 + $0x158] sm:$0xff]  ;;  %v595_v54 = vld [vmem:[%s421_s12 + $0x160] sm:$0xff] }
  0x22   : > { %v601_v31 = vld [vmem:[%s421_s12 + $0x168] sm:$0xff]  ;;  %v604_v38 = vld [vmem:[%s421_s12 + $0x170] sm:$0xff]  ;;  %v607_v48 = vld [vmem:[%s421_s12 + $0x178] sm:$0xff]  ;;  %v936_v57 = vmax.f32 %v592_v44, 0.0 }
  0x23   : > { %v613_v25 = vld [vmem:[%s421_s12 + $0x180] sm:$0xff]  ;;  %v616_v32 = vld [vmem:[%s421_s12 + $0x188] sm:$0xff]  ;;  %v619_v42 = vld [vmem:[%s421_s12 + $0x190] sm:$0xff] }
  0x24   : > { %v625_v26 = vld [vmem:[%s421_s12 + $0x198] sm:$0xff]  ;;  %v628_v19 = vld [vmem:[%s421_s12 + $0x1a0] sm:$0xff]  ;;  %v631_v36 = vld [vmem:[%s421_s12 + $0x1a8] sm:$0xff]  ;;  %v942_v44 = vmax.f32 %v616_v32, 0.0 }
  0x25   : > { %887 = vst [vmem:[#allocation2_spill] sm:$0xff] %v625_v26  ;;  %888 = vst [vmem:[#allocation3_spill] sm:$0xff] %v628_v19  ;;  %v637_v20 = vld [vmem:[%s421_s12 + $0x1b0] sm:$0xff]  ;;  %v640_v13 = vld [vmem:[%s421_s12 + $0x1b8] sm:$0xff]  ;;  %v893_v26 = vmax.f32 %v424_v0, 0.0  ;;  %v898_v0 = vmax.f32 %v439_v5, 0.0 }
  0x26   : > { %889 = vst [vmem:[#allocation4_spill] sm:$0xff] %v631_v36  ;;  %890 = vst [vmem:[#allocation5_spill] sm:$0xff] %v637_v20  ;;  %v643_v30 = vld [vmem:[%s421_s12 + $0x1c0] sm:$0xff]  ;;  %v656_v24 = vld [vmem:[%s421_s12 + $0x1c8] sm:$0xff]  ;;  %v903_v5 = vmax.f32 %v460_v16, 0.0  ;;  %v910_v16 = vmax.f32 %v487_v29, 0.0 }
  0x27   : > { %891 = vst [vmem:[#allocation6_spill] sm:$0xff] %v640_v13  ;;  %892 = vst [vmem:[#allocation7_spill] sm:$0xff] %v643_v30  ;;  %v659_v14 = vld [vmem:[%s421_s12 + $0x1d0] sm:$0xff]  ;;  %v662_v7 = vld [vmem:[%s421_s12 + $0x1d8] sm:$0xff]  ;;  %v896_v30 = vmax.f32 %v433_v3, 0.0  ;;  %v897_v13 = vmax.f32 %v436_v4, 0.0 }
  0x28   : > { %v668_v6 = vld [vmem:[%s421_s12 + $0x1e0] sm:$0xff]  ;;  %v671_v36 = vld [vmem:[%s421_s12 + $0x1e8] sm:$0xff]  ;;  %v674_v19 = vld [vmem:[%s421_s12 + $0x1f0] sm:$0xff]  ;;  %v901_v3 = vmax.f32 %v451_v11, 0.0  ;;  %v902_v4 = vmax.f32 %v457_v15, 0.0  ;;  %v906_v11 = vmax.f32 %v472_v22, 0.0 }
  0x29   : > { %v680_v8 = vld [vmem:[%s421_s12 + $0x1f8] sm:$0xff]  ;;  %v246_v20 = vmax.f32 %v674_v19, 0.0  ;;  %v909_v15 = vmax.f32 %v484_v28, 0.0  ;;  %v914_v22 = vmax.f32 %v505_v39, 0.0  ;;  %v918_v28 = vmax.f32 %v520_v46, 0.0 }
  0x2a   : > { %248 = vst [vmem:[%s653_s15] sm:$0xff] %v893_v26  ;;  %249 = vst [vmem:[%s653_s15 + $0x8] sm:$0xff] %v894_v12  ;;  %v907_v12 = vmax.f32 %v475_v23, 0.0  ;;  %v915_v23 = vmax.f32 %v508_v40, 0.0  ;;  %v916_v26 = vmax.f32 %v511_v41, 0.0  ;;  %v919_v29 = vmax.f32 %v523_v47, 0.0 }
  0x2b   : > { %250 = vst [vmem:[%s653_s15 + $0x10] sm:$0xff] %v895_v18  ;;  %251 = vst [vmem:[%s653_s15 + $0x18] sm:$0xff] %v896_v30  ;;  %v912_v18 = vmax.f32 %v496_v34, 0.0  ;;  %v920_v30 = vmax.f32 %v529_v51, 0.0  ;;  %v922_v34 = vmax.f32 %v535_v53, 0.0  ;;  %v924_v39 = vmax.f32 %v544_v58, 0.0 }
  0x2c   : > { %252 = vst [vmem:[%s653_s15 + $0x20] sm:$0xff] %v897_v13  ;;  %253 = vst [vmem:[%s653_s15 + $0x28] sm:$0xff] %v898_v0  ;;  %v908_v13 = vmax.f32 %v481_v27, 0.0  ;;  %v917_v27 = vmax.f32 %v517_v45, 0.0  ;;  %v925_v40 = vmax.f32 %v547_v59, 0.0  ;;  %v926_v41 = vmax.f32 %v553_v63, 0.0 }
  0x2d   : > { %254 = vst [vmem:[%s653_s15 + $0x30] sm:$0xff] %v899_v1  ;;  %255 = vst [vmem:[%s653_s15 + $0x38] sm:$0xff] %v900_v2  ;;  %v927_v45 = vmax.f32 %v556_v55, 0.0  ;;  %v928_v46 = vmax.f32 %v559_v56, 0.0  ;;  %v929_v47 = vmax.f32 %v565_v49, 0.0  ;;  %v930_v51 = vmax.f32 %v568_v61, 0.0 }
  0x2e   : > { %256 = vst [vmem:[%s653_s15 + $0x40] sm:$0xff] %v901_v3  ;;  %257 = vst [vmem:[%s653_s15 + $0x48] sm:$0xff] %v902_v4  ;;  %v932_v53 = vmax.f32 %v577_v43, 0.0  ;;  %v933_v55 = vmax.f32 %v580_v50, 0.0  ;;  %v934_v49 = vmax.f32 %v583_v60, 0.0  ;;  %v935_v56 = vmax.f32 %v589_v37, 0.0 }
  0x2f   : > { %258 = vst [vmem:[%s653_s15 + $0x50] sm:$0xff] %v903_v5  ;;  %259 = vst [vmem:[%s653_s15 + $0x58] sm:$0xff] %v904_v9  ;;  %v937_v43 = vmax.f32 %v595_v54, 0.0  ;;  %v938_v50 = vmax.f32 %v601_v31, 0.0  ;;  %v939_v58 = vmax.f32 %v604_v38, 0.0  ;;  %v940_v59 = vmax.f32 %v607_v48, 0.0 }
  0x30   : > { %260 = vst [vmem:[%s653_s15 + $0x60] sm:$0xff] %v905_v10  ;;  %261 = vst [vmem:[%s653_s15 + $0x68] sm:$0xff] %v906_v11  ;;  %v941_v37 = vmax.f32 %v613_v25, 0.0  ;;  %v943_v54 = vmax.f32 %v619_v42, 0.0  ;;  %v944_v31 = vld [vmem:[#allocation2_spill] sm:$0xff]  ;;  %v946_v38 = vld [vmem:[#allocation3_spill] sm:$0xff] }
  0x31   : > { %262 = vst [vmem:[%s653_s15 + $0x70] sm:$0xff] %v907_v12  ;;  %263 = vst [vmem:[%s653_s15 + $0x78] sm:$0xff] %v908_v13  ;;  %v945_v60 = vmax.f32 %v944_v31, 0.0  ;;  %v947_v61 = vmax.f32 %v946_v38, 0.0  ;;  %v948_v48 = vld [vmem:[#allocation4_spill] sm:$0xff]  ;;  %v950_v63 = vld [vmem:[#allocation5_spill] sm:$0xff] }
  0x32   : > { %264 = vst [vmem:[%s653_s15 + $0x80] sm:$0xff] %v909_v15  ;;  %265 = vst [vmem:[%s653_s15 + $0x88] sm:$0xff] %v910_v16  ;;  %v949_v62 = vmax.f32 %v948_v48, 0.0  ;;  %v951_v25 = vmax.f32 %v950_v63, 0.0  ;;  %v952_v0 = vld [vmem:[#allocation6_spill] sm:$0xff]  ;;  %v954_v32 = vld [vmem:[#allocation7_spill] sm:$0xff] }
  0x33   : > { %266 = vst [vmem:[%s653_s15 + $0x90] sm:$0xff] %v911_v17  ;;  %267 = vst [vmem:[%s653_s15 + $0x98] sm:$0xff] %v912_v18  ;;  %v953_v1 = vmax.f32 %v952_v0, 0.0  ;;  %v955_v2 = vmax.f32 %v954_v32, 0.0  ;;  %v956_v42 = vmax.f32 %v656_v24, 0.0  ;;  %v957_v3 = vmax.f32 %v659_v14, 0.0 }
  0x34   : > { %268 = vst [vmem:[%s653_s15 + $0xa0] sm:$0xff] %v913_v21  ;;  %269 = vst [vmem:[%s653_s15 + $0xa8] sm:$0xff] %v914_v22  ;;  %v958_v4 = vmax.f32 %v662_v7, 0.0  ;;  %v247_v5 = vmax.f32 %v680_v8, 0.0  ;;  %v959_v9 = vmax.f32 %v668_v6, 0.0  ;;  %v960_v10 = vmax.f32 %v671_v36, 0.0 }
  0x35   : > { %270 = vst [vmem:[%s653_s15 + $0xb0] sm:$0xff] %v915_v23  ;;  %271 = vst [vmem:[%s653_s15 + $0xb8] sm:$0xff] %v916_v26 }
  0x36   : > { %272 = vst [vmem:[%s653_s15 + $0xc0] sm:$0xff] %v917_v27  ;;  %273 = vst [vmem:[%s653_s15 + $0xc8] sm:$0xff] %v918_v28 }
  0x37   : > { %274 = vst [vmem:[%s653_s15 + $0xd0] sm:$0xff] %v919_v29  ;;  %275 = vst [vmem:[%s653_s15 + $0xd8] sm:$0xff] %v920_v30 }
  0x38   : > { %276 = vst [vmem:[%s653_s15 + $0xe0] sm:$0xff] %v921_v33  ;;  %277 = vst [vmem:[%s653_s15 + $0xe8] sm:$0xff] %v922_v34 }
  0x39   : > { %278 = vst [vmem:[%s653_s15 + $0xf0] sm:$0xff] %v923_v35  ;;  %279 = vst [vmem:[%s653_s15 + $0xf8] sm:$0xff] %v924_v39 }
  0x3a   : > { %280 = vst [vmem:[%s653_s15 + $0x100] sm:$0xff] %v925_v40  ;;  %281 = vst [vmem:[%s653_s15 + $0x108] sm:$0xff] %v926_v41 }
  0x3b   : > { %282 = vst [vmem:[%s653_s15 + $0x110] sm:$0xff] %v927_v45  ;;  %283 = vst [vmem:[%s653_s15 + $0x118] sm:$0xff] %v928_v46 }
  0x3c   : > { %284 = vst [vmem:[%s653_s15 + $0x120] sm:$0xff] %v929_v47  ;;  %285 = vst [vmem:[%s653_s15 + $0x128] sm:$0xff] %v930_v51 }
  0x3d   : > { %286 = vst [vmem:[%s653_s15 + $0x130] sm:$0xff] %v931_v52  ;;  %287 = vst [vmem:[%s653_s15 + $0x138] sm:$0xff] %v932_v53 }
  0x3e   : > { %288 = vst [vmem:[%s653_s15 + $0x140] sm:$0xff] %v933_v55  ;;  %289 = vst [vmem:[%s653_s15 + $0x148] sm:$0xff] %v934_v49 }
  0x3f   : > { %290 = vst [vmem:[%s653_s15 + $0x150] sm:$0xff] %v935_v56  ;;  %291 = vst [vmem:[%s653_s15 + $0x158] sm:$0xff] %v936_v57 }
  0x40   : > { %292 = vst [vmem:[%s653_s15 + $0x160] sm:$0xff] %v937_v43  ;;  %293 = vst [vmem:[%s653_s15 + $0x168] sm:$0xff] %v938_v50 }
  0x41   : > { %294 = vst [vmem:[%s653_s15 + $0x170] sm:$0xff] %v939_v58  ;;  %295 = vst [vmem:[%s653_s15 + $0x178] sm:$0xff] %v940_v59 }
  0x42   : > { %296 = vst [vmem:[%s653_s15 + $0x180] sm:$0xff] %v941_v37  ;;  %297 = vst [vmem:[%s653_s15 + $0x188] sm:$0xff] %v942_v44 }
  0x43   : > { %298 = vst [vmem:[%s653_s15 + $0x190] sm:$0xff] %v943_v54  ;;  %299 = vst [vmem:[%s653_s15 + $0x198] sm:$0xff] %v945_v60 }
  0x44   : > { %300 = vst [vmem:[%s653_s15 + $0x1a0] sm:$0xff] %v947_v61  ;;  %301 = vst [vmem:[%s653_s15 + $0x1a8] sm:$0xff] %v949_v62 }
  0x45   : > { %302 = vst [vmem:[%s653_s15 + $0x1b0] sm:$0xff] %v951_v25  ;;  %303 = vst [vmem:[%s653_s15 + $0x1b8] sm:$0xff] %v953_v1 }
  0x46   : > { %304 = vst [vmem:[%s653_s15 + $0x1c0] sm:$0xff] %v955_v2  ;;  %305 = vst [vmem:[%s653_s15 + $0x1c8] sm:$0xff] %v956_v42 }
  0x47   : > { %306 = vst [vmem:[%s653_s15 + $0x1d0] sm:$0xff] %v957_v3  ;;  %307 = vst [vmem:[%s653_s15 + $0x1d8] sm:$0xff] %v958_v4 }
  0x48   : > { %308 = vst [vmem:[%s653_s15 + $0x1e0] sm:$0xff] %v959_v9  ;;  %309 = vst [vmem:[%s653_s15 + $0x1e8] sm:$0xff] %v960_v10 }
  0x49   : > { %310 = vst [vmem:[%s653_s15 + $0x1f0] sm:$0xff] %v246_v20  ;;  %311 = vst [vmem:[%s653_s15 + $0x1f8] sm:$0xff] %v247_v5 }
  0x4a PF: > { %s11_s6 = sadd.s32 1, %s393_s6  }
  0x4b   : > { %p8_p4 = scmp.ge.s32.totalorder %s11_s6, 10  }
  0x4d   :  { %10 = sbr.rel (!%p8_p4) target bundleno = 1 (0x1), region = 54 }

</bundles_post_ra>
